<compile_context>
chip_gen: v6e
topology: v6e:2x2x1
jax: 0.10.0
libtpu: 0.0.40
codegen_flags: <defaults>
</compile_context>

<pallas_src>
import functools
import math

import jax
import jax.numpy as jnp
from jax import lax
from jax.experimental import pallas as pl
from jax.experimental.pallas import tpu as pltpu


# ------------------------------ tile helpers --------------------------------

def _sublane_align(dtype):
    # bf16 / fp16 min tile is (16, 128); f32 is (8, 128).
    return 16 if jnp.dtype(dtype).itemsize == 2 else 8


def _pick_tile(dim, preferred, align):
    """Largest `align`-aligned divisor of `dim` that is <= `preferred`.

    Dims that already fit (`dim <= preferred`) use the full dimension (a full
    block is always layout-legal).  If nothing aligned divides `dim`, raise a
    clear error instead of silently returning a huge block.
    """
    if dim <= preferred:
        return dim
    t = (preferred // align) * align
    while t >= align:
        if dim % t == 0:
            return t
        t -= align
    # TODO(synk): pad the array to the next aligned multiple and mask (pl.cdiv
    # grid) instead of erroring for awkward L / D.
    raise ValueError(
        f"No {align}-aligned tile <= {preferred} divides dimension {dim}; "
        "pad the input to an aligned multiple.")


# ----------------------------- Pallas kernels --------------------------------

def _linear_kernel(x_ref, w_ref, b_ref, o_ref, acc_ref):
    # x: (tm, tk), w: (tk, tn), b: (1, tn) -> o: (tm, tn); reduce over K axis.
    k = pl.program_id(2)

    @pl.when(k == 0)
    def _init():
        acc_ref[...] = jnp.zeros_like(acc_ref)

    # Activations are cast to the weight dtype *inside* the kernel (no extra
    # wrapper-side XLA cast pass / HBM round trip); accumulation stays f32.
    acc_ref[...] += jnp.dot(x_ref[...].astype(w_ref.dtype), w_ref[...],
                            preferred_element_type=jnp.float32)

    @pl.when(k == pl.num_programs(2) - 1)
    def _finalize():
        o_ref[...] = (acc_ref[...] + b_ref[...]).astype(o_ref.dtype)


def _flash_attention_kernel(q_ref, k_ref, v_ref, o_ref, m_sc, l_sc, acc_sc, *,
                            num_heads):
    # q_ref: (tq, H, hd), k_ref/v_ref: (tk, H, hd) — direct views of the fused
    # qkv projection (slot selected by the BlockSpec, no HBM permute).
    # Online softmax over the kv grid axis; f32 running stats / accumulator.
    ki = pl.program_id(2)

    @pl.when(ki == 0)
    def _init():
        m_sc[...] = jnp.full(m_sc.shape, -jnp.inf, m_sc.dtype)
        l_sc[...] = jnp.zeros_like(l_sc)
        acc_sc[...] = jnp.zeros_like(acc_sc)

    # Heads are unrolled statically: every per-head op is a plain 2-D matmul /
    # elementwise op (no 3-D transposes inside the kernel).
    for h in range(num_heads):
        q_h = q_ref[:, h, :]                       # (tq, hd)  (scale pre-folded)
        k_h = k_ref[:, h, :]                       # (tk, hd)
        v_h = v_ref[:, h, :]                       # (tk, hd)

        # scores: contract head_dim of both operands (rhs effectively transposed).
        s = lax.dot_general(q_h, k_h, (((1,), (1,)), ((), ())),
                            preferred_element_type=jnp.float32)   # (tq, tk)

        m_prev = m_sc[h]                                           # (tq, 1)
        m_new = jnp.maximum(m_prev, jnp.max(s, axis=-1, keepdims=True))
        alpha = jnp.exp(m_prev - m_new)
        p = jnp.exp(s - m_new)                                     # (tq, tk)
        l_sc[h] = alpha * l_sc[h] + jnp.sum(p, axis=-1, keepdims=True)
        acc_sc[h] = alpha * acc_sc[h] + jnp.dot(
            p.astype(v_ref.dtype), v_h, preferred_element_type=jnp.float32)
        m_sc[h] = m_new

    @pl.when(ki == pl.num_programs(2) - 1)
    def _finalize():
        # Write the context in (tq, H, hd) order == lane-dense (tq, D) columns
        # of the (B, L, D) context consumed by the output projection.
        for h in range(num_heads):
            inv_l = pl.reciprocal(l_sc[h], approx=True)   # l >= 1, error ~1e-4
            o_ref[:, h, :] = (acc_sc[h] * inv_l).astype(o_ref.dtype)


# -------------------------------- Wrappers -----------------------------------

def pallas_linear(x2d, w, b, *, out_dtype=None, tm=None, tn=None, tk=None,
                  vmem_limit_bytes=None):
    """x2d: (M, K), w: (K, N), b: (N,) or (1, N) -> (M, N), tiled + pipelined."""
    M, K = x2d.shape
    K2, N = w.shape
    assert K == K2, (x2d.shape, w.shape)
    out_dtype = out_dtype if out_dtype is not None else w.dtype
    sub = _sublane_align(w.dtype)

    tm = tm if tm is not None else _pick_tile(M, 512, sub)
    tn = tn if tn is not None else _pick_tile(N, 512, 128)
    # Full-depth K tile when it is small enough (fewer weight re-reads).
    tk = tk if tk is not None else (K if K <= 2048 else _pick_tile(K, 512, 128))
    grid = (M // tm, N // tn, K // tk)

    b2 = jnp.asarray(b).reshape(1, N)

    return pl.pallas_call(
        _linear_kernel,
        out_shape=jax.ShapeDtypeStruct((M, N), out_dtype),
        grid=grid,
        in_specs=[
            pl.BlockSpec((tm, tk), lambda i, j, k: (i, k)),
            pl.BlockSpec((tk, tn), lambda i, j, k: (k, j)),
            pl.BlockSpec((1, tn), lambda i, j, k: (0, j)),
        ],
        out_specs=pl.BlockSpec((tm, tn), lambda i, j, k: (i, j)),
        scratch_shapes=[pltpu.VMEM((tm, tn), jnp.float32)],
        compiler_params=pltpu.CompilerParams(
            dimension_semantics=("parallel", "parallel", "arbitrary"),
            vmem_limit_bytes=vmem_limit_bytes),
    )(x2d, w, b2)


def pallas_flash_attention(qkv5, num_heads, *, out_dtype=None, tq=None, tk=None,
                           vmem_limit_bytes=None):
    """qkv5: (B, L, 3, H, hd) view of the fused QKV projection output.

    Returns the context as (B, L, H, hd) (== lane-dense (B, L, D) in memory).
    The 1/sqrt(head_dim) scale is assumed folded into the q projection.
    """
    B, L, three, H, hd = qkv5.shape
    assert three == 3 and H == num_heads
    out_dtype = out_dtype if out_dtype is not None else qkv5.dtype
    sub = _sublane_align(qkv5.dtype)

    # Larger q tiles cut K/V HBM re-reads and per-step overhead; kv tiles are
    # 128-lane aligned so the (tq, tk) score tile stays lane-dense.  On v6e
    # (128 MiB VMEM) these can be raised to 512 together with vmem_limit_bytes;
    # keep the defaults on v7x (64 MiB physical / 32 MiB scoped).
    tq = tq if tq is not None else _pick_tile(L, 256, sub)
    tk = tk if tk is not None else _pick_tile(L, 256, 128 if L >= 128 else sub)
    grid = (B, L // tq, L // tk)

    # q/k/v are different slot slabs of the *same* array -> pass it three times
    # with slot-selecting index maps (no HBM permute, no slice copies).
    q_spec = pl.BlockSpec((None, tq, None, H, hd), lambda b, qi, ki: (b, qi, 0, 0, 0))
    k_spec = pl.BlockSpec((None, tk, None, H, hd), lambda b, qi, ki: (b, ki, 1, 0, 0))
    v_spec = pl.BlockSpec((None, tk, None, H, hd), lambda b, qi, ki: (b, ki, 2, 0, 0))
    o_spec = pl.BlockSpec((None, tq, H, hd), lambda b, qi, ki: (b, qi, 0, 0))

    kernel = functools.partial(_flash_attention_kernel, num_heads=H)

    return pl.pallas_call(
        kernel,
        out_shape=jax.ShapeDtypeStruct((B, L, H, hd), out_dtype),
        grid=grid,
        in_specs=[q_spec, k_spec, v_spec],
        out_specs=o_spec,
        scratch_shapes=[
            pltpu.VMEM((H, tq, 1), jnp.float32),    # running max
            pltpu.VMEM((H, tq, 1), jnp.float32),    # running denom
            pltpu.VMEM((H, tq, hd), jnp.float32),   # running accumulator
        ],
        compiler_params=pltpu.CompilerParams(
            dimension_semantics=("parallel", "parallel", "arbitrary"),
            vmem_limit_bytes=vmem_limit_bytes),
    )(qkv5, qkv5, qkv5)


def prepare_params(raw_params, hidden_size, num_heads, compute_dtype=jnp.float32):
    """One-time weight transform.

    Folds 1/sqrt(head_dim) into the q projection (weights + bias) and casts the
    weights to the MXU compute dtype once (no per-call wrapper casts).  Biases
    stay f32 (added to the f32 accumulator).
    """
    head_dim = hidden_size // num_heads
    scale = 1.0 / math.sqrt(head_dim)
    qkv_w = raw_params["qkv_w"].astype(jnp.float32)
    qkv_b = raw_params["qkv_b"].astype(jnp.float32)
    qkv_w = qkv_w.at[:, :hidden_size].multiply(scale)
    qkv_b = qkv_b.at[:hidden_size].multiply(scale)
    return {
        "qkv_w": qkv_w.astype(compute_dtype),
        "qkv_b": qkv_b.reshape(1, -1),
        "dense_w": raw_params["dense_w"].astype(compute_dtype),
        "dense_b": raw_params["dense_b"].astype(jnp.float32).reshape(1, -1),
    }


def attention_forward(x, params, num_heads, *, compute_dtype=jnp.float32,
                      flash_tq=None, flash_tk=None, vmem_limit_bytes=None):
    """Equivalent to Attention.forward in eval mode.

    x: (B, L, D).  params: output of prepare_params (q-scale folded, weights
    stored (in, out) and pre-cast to compute_dtype).  Use compute_dtype=bf16 on
    v6e/v7x; softmax math and accumulation stay f32 inside the kernels.
    """
    B, L, D = x.shape
    head_dim = D // num_heads

    x2d = x.reshape(B * L, D)
    qkv = pallas_linear(x2d, params["qkv_w"], params["qkv_b"],
                        out_dtype=compute_dtype,
                        vmem_limit_bytes=vmem_limit_bytes)        # (B*L, 3D)

    # Free (row-major dim split) reshape: (B*L, 3D) -> (B, L, 3, H, hd).
    # Replaces the old reshape + transpose + slice HBM round trip; the flash
    # BlockSpecs pick out the q/k/v slot and all heads directly.
    qkv5 = qkv.reshape(B, L, 3, num_heads, head_dim)

    ctx = pallas_flash_attention(qkv5, num_heads, out_dtype=compute_dtype,
                                 tq=flash_tq, tk=flash_tk,
                                 vmem_limit_bytes=vmem_limit_bytes)  # (B,L,H,hd)

    # (B, L, H, hd) is lane-dense (B*L, D) in memory -> free reshape, then a
    # standard full-depth matmul for the output projection (256-deep-friendly
    # MXU contraction, lane-dense stores, dense weight streamed once per M tile).
    ctx2d = ctx.reshape(B * L, D)
    out = pallas_linear(ctx2d, params["dense_w"], params["dense_b"],
                        out_dtype=x.dtype,
                        vmem_limit_bytes=vmem_limit_bytes)        # (B*L, D)

    # output_dropout: identity in eval mode.
    # TODO(synk): training-mode RNG dropout path is not implemented.
    return out.reshape(B, L, D)


# -------------------------- Reference (plain JAX) ----------------------------

def reference_forward(x, raw_params, num_heads):
    B, L, D = x.shape
    hd = D // num_heads
    qkv = x @ raw_params["qkv_w"] + raw_params["qkv_b"]
    qkv = qkv.reshape(B, L, 3, num_heads, hd).transpose(2, 0, 3, 1, 4)
    q, k, v = qkv[0], qkv[1], qkv[2]
    s = jnp.einsum("bhqd,bhkd->bhqk", q / math.sqrt(hd), k)
    p = jax.nn.softmax(s, axis=-1)
    ctx = jnp.einsum("bhqk,bhkd->bhqd", p, v)
    ctx = ctx.transpose(0, 2, 1, 3).reshape(B, L, D)
    return ctx @ raw_params["dense_w"] + raw_params["dense_b"]


# ---------------------------------- Main --------------------------------------

if __name__ == "__main__":
    B, L, D = 2, 16, 32
    num_heads = 4

    key = jax.random.PRNGKey(0)
    kx, kw1, kb1, kw2, kb2 = jax.random.split(key, 5)

    x = jax.random.normal(kx, (B, L, D), dtype=jnp.float32)

    # PyTorch Linear weights, stored pre-transposed (in, out).
    bound1 = 1.0 / math.sqrt(D)
    raw_params = {
        "qkv_w": jax.random.uniform(kw1, (D, 3 * D), jnp.float32, -bound1, bound1),
        "qkv_b": jax.random.uniform(kb1, (3 * D,), jnp.float32, -bound1, bound1),
        "dense_w": jax.random.uniform(kw2, (D, D), jnp.float32, -bound1, bound1),
        "dense_b": jax.random.uniform(kb2, (D,), jnp.float32, -bound1, bound1),
    }
    params = prepare_params(raw_params, D, num_heads, compute_dtype=jnp.float32)

    # Small flash tiles here purely to exercise the multi-step online-softmax
    # carry (L=16 with tq=tk=8 -> 2x2 q/kv tiles per batch); production leaves
    # flash_tq/flash_tk unset (256-class tiles) and uses compute_dtype=bf16.
    out = attention_forward(x, params, num_heads, compute_dtype=jnp.float32,
                            flash_tq=8, flash_tk=8)
    out = jax.block_until_ready(out)

    ref = reference_forward(x, raw_params, num_heads)
    assert out.shape == (B, L, D), out.shape
    assert jnp.allclose(out, ref, atol=5e-3, rtol=5e-3), float(
        jnp.max(jnp.abs(out - ref)))

    print("KERNEL_OK")
</pallas_src>

<mosaic_0001>
module attributes {stable_mosaic.version = 11 : i64} {
  func.func @_linear_kernel(%arg0: i32, %arg1: i32, %arg2: i32, %arg3: memref<32x32xf32, #tpu.memory_space<vmem>>, %arg4: memref<32x96xf32, #tpu.memory_space<vmem>>, %arg5: memref<1x96xf32, #tpu.memory_space<vmem>>, %arg6: memref<32x96xf32, #tpu.memory_space<vmem>>, %arg7: memref<32x96xf32, #tpu.memory_space<vmem>>) attributes {dimension_semantics = [#tpu.dimension_semantics<parallel>, #tpu.dimension_semantics<parallel>, #tpu.dimension_semantics<arbitrary>], iteration_bounds = array<i64: 1, 1, 1>, scalar_prefetch = 0 : i64, scratch_operands = 1 : i64, tpu.core_type = #tpu.core_type<tc>, window_params = [{transform_indices = @transform_0, window_bounds = array<i64: 32, 32>}, {transform_indices = @transform_1, window_bounds = array<i64: 32, 96>}, {transform_indices = @transform_2, window_bounds = array<i64: 1, 96>}, {transform_indices = @transform_3, window_bounds = array<i64: 32, 96>}]} {
    %c0_i32 = arith.constant 0 : i32
    %0 = arith.cmpi eq, %arg2, %c0_i32 : i32
    %1 = arith.extui %0 : i1 to i32
    %c0_i32_0 = arith.constant 0 : i32
    %2 = arith.cmpi ne, %1, %c0_i32_0 : i32
    scf.if %2 {
      %cst_10 = arith.constant 0.000000e+00 : f32
      %12 = vector.broadcast %cst_10 : f32 to vector<32x96xf32>
      %c0_11 = arith.constant 0 : index
      %c0_12 = arith.constant 0 : index
      %13 = vector.load %arg7[%c0_11, %c0_12] : memref<32x96xf32, #tpu.memory_space<vmem>>, vector<32x96xf32>
      tpu.vector_store %arg7[%c0_11, %c0_12], %12 {strides = array<i32>} : memref<32x96xf32, #tpu.memory_space<vmem>>, vector<32x96xf32>,
    } else {
    }
    %c0 = arith.constant 0 : index
    %c0_1 = arith.constant 0 : index
    %3 = vector.load %arg7[%c0, %c0_1] : memref<32x96xf32, #tpu.memory_space<vmem>>, vector<32x96xf32>
    %c0_2 = arith.constant 0 : index
    %c0_3 = arith.constant 0 : index
    %4 = vector.load %arg3[%c0_2, %c0_3] : memref<32x32xf32, #tpu.memory_space<vmem>>, vector<32x32xf32>
    %c0_4 = arith.constant 0 : index
    %c0_5 = arith.constant 0 : index
    %5 = vector.load %arg4[%c0_4, %c0_5] : memref<32x96xf32, #tpu.memory_space<vmem>>, vector<32x96xf32>
    %cst = arith.constant dense<0.000000e+00> : vector<32x96xf32>
    %6 = tpu.matmul %4, %5, %cst {dimension_numbers = #tpu.dot_dimension_numbers<[1], [0], [0], [1], [0, 0, 1, 1], [], []>} : vector<32x32xf32>, vector<32x96xf32>, vector<32x96xf32> -> vector<32x96xf32>
    %7 = arith.addf %3, %6 : vector<32x96xf32>
    %c0_6 = arith.constant 0 : index
    %c0_7 = arith.constant 0 : index
    %8 = vector.load %arg7[%c0_6, %c0_7] : memref<32x96xf32, #tpu.memory_space<vmem>>, vector<32x96xf32>
    tpu.vector_store %arg7[%c0_6, %c0_7], %7 {strides = array<i32>} : memref<32x96xf32, #tpu.memory_space<vmem>>, vector<32x96xf32>,
    %c0_i32_8 = arith.constant 0 : i32
    %9 = arith.cmpi eq, %arg2, %c0_i32_8 : i32
    %10 = arith.extui %9 : i1 to i32
    %c0_i32_9 = arith.constant 0 : i32
    %11 = arith.cmpi ne, %10, %c0_i32_9 : i32
    scf.if %11 {
      %c0_10 = arith.constant 0 : index
      %c0_11 = arith.constant 0 : index
      %12 = vector.load %arg7[%c0_10, %c0_11] : memref<32x96xf32, #tpu.memory_space<vmem>>, vector<32x96xf32>
      %c0_12 = arith.constant 0 : index
      %c0_13 = arith.constant 0 : index
      %13 = vector.load %arg5[%c0_12, %c0_13] : memref<1x96xf32, #tpu.memory_space<vmem>>, vector<1x96xf32>
      %14 = vector.broadcast %13 : vector<1x96xf32> to vector<32x96xf32>
      %15 = arith.addf %12, %14 : vector<32x96xf32>
      %c0_14 = arith.constant 0 : index
      %c0_15 = arith.constant 0 : index
      %16 = vector.load %arg6[%c0_14, %c0_15] : memref<32x96xf32, #tpu.memory_space<vmem>>, vector<32x96xf32>
      tpu.vector_store %arg6[%c0_14, %c0_15], %15 {strides = array<i32>} : memref<32x96xf32, #tpu.memory_space<vmem>>, vector<32x96xf32>,
    } else {
    }
    return
  }
  func.func @transform_0(%arg0: i32, %arg1: i32, %arg2: i32) -> (i32, i32) {
    %c0_i32 = arith.constant 0 : i32
    return %arg0, %arg2 : i32, i32
  }
  func.func @transform_1(%arg0: i32, %arg1: i32, %arg2: i32) -> (i32, i32) {
    %c0_i32 = arith.constant 0 : i32
    return %arg2, %arg1 : i32, i32
  }
  func.func @transform_2(%arg0: i32, %arg1: i32, %arg2: i32) -> (i32, i32) {
    %c0_i32 = arith.constant 0 : i32
    %c0_i32_0 = arith.constant 0 : i32
    return %c0_i32, %arg1 : i32, i32
  }
  func.func @transform_3(%arg0: i32, %arg1: i32, %arg2: i32) -> (i32, i32) {
    %c0_i32 = arith.constant 0 : i32
    return %arg0, %arg1 : i32, i32
  }
}

</mosaic_0001>

<bundles_post_ra>
// kernel: tpu_custom_call.1
= control target key start
LH: loop header
LB: loop body
LE: loop exit
PB: predicated region body
PF: predicated region fallthrough
CT: control target
= control target key end

     0   :  { %8 = vsyncpa [#allocation4], 0  ;;  %s377_s0 = inlined_call_operand.hbm [shape: f32[32,32], index: 0, kind: input, shape index: {}]   ;;  %s378_s1 = inlined_call_operand.hbm [shape: f32[32,96], index: 1, kind: input, shape index: {}]   ;;  %s379_s2 = inlined_call_operand.vmem [shape: f32[1,96], index: 2, kind: input, shape index: {}]   ;;  %s380_s3 = inlined_call_operand.hbm [shape: f32[32,96], index: 3, kind: output, shape index: {}]  }
   0x1   :  { %9 = vsyncpa [#allocation7], 0 }
   0x2   :  { %10 = vsyncpa [#allocation5], 0  ;;  %s318_s12 = smov [#allocation3]  }
   0x3   :  { %s16_s13 = sshll.u32 %s318_s12, 4  ;;  %s17_s13 = int_to_ptr.vmem [resolvable:$true] %s16_s13 }
   0x4   :  { %s260_s14 = scalar_lea.vmem %s17_s13, 512  ;;  %p265_p1 = scmp.lt.s32.totalorder %s17_s13, %s17_s13 }
   0x5   :  { %p261_p0 = scmp.ne.s32.totalorder %s17_s13, %s260_s14  ;;  %p266_p2 = scmp.lt.s32.totalorder %s260_s14, %s260_s14 }
   0x7   :  { %p267_p3 = por %p266_p2, %p265_p1 }
   0x9   :  { %p268_p4 = pnand %p267_p3, %p261_p0 }
   0xb   :  { %271 = shalt.err (!%p268_p4)
}
   0xc   :  { %s319_s15 = smov 128   ;;  %s320_s16 = smov 8  }
   0xd   :  { %22 = dma.hbm_to_vmem [thread:$0]  %s377_s0, 512, %s17_s13, [#allocation4], %s319_s15, %s319_s15, %s320_s16  }
   0xe   :  { %s321_s19 = smov [#allocation6]  }
   0xf   :  { %s28_s20 = sshll.u32 %s321_s19, 4  ;;  %s29_s20 = int_to_ptr.vmem [resolvable:$true] %s28_s20 }
  0x10   :  { %s280_s21 = scalar_lea.vmem %s29_s20, 512  ;;  %p285_p6 = scmp.lt.s32.totalorder %s29_s20, %s29_s20 }
  0x11   :  { %p281_p5 = scmp.ne.s32.totalorder %s29_s20, %s280_s21  ;;  %p286_p7 = scmp.lt.s32.totalorder %s280_s21, %s280_s21 }
  0x13   :  { %p287_p8 = por %p286_p7, %p285_p6 }
  0x15   :  { %p288_p9 = pnand %p287_p8, %p281_p5 }
  0x17   :  { %291 = shalt.err (!%p288_p9)
}
  0x18   :  { %34 = dma.hbm_to_vmem [thread:$0]  %s378_s1, 512, %s29_s20, [#allocation7], %s319_s15, %s319_s15, %s320_s16  }
  0x19   :  { %312 = dma.done.wait [#allocation4], 512  }
  0x1a   :  { %313 = vsyncadd [#allocation4], 4294966784 }
  0x1b   :  { %314 = dma.done.wait [#allocation7], 512  }
  0x1c   :  { %315 = vsyncadd [#allocation7], 4294966784  ;;  %vm47_vm0 = vcmask 785408   ;;  %v322_v0 = vmov 0.0   ;;  %v63_v1 = vld [vmem:[#allocation6 + $0x18] sm:$0xff]  ;;  %v62_v2 = vld [vmem:[#allocation6 + $0x10] sm:$0xff] }
  0x1d   :  { %49 = vst.msk [vmem:[#allocation2 + $0x8] sm:$0xff] %vm47_vm0, %v322_v0  ;;  %48 = vst.msk [vmem:[#allocation2] sm:$0xff] %vm47_vm0, %v322_v0  ;;  %224 = vmatprep.subr.mxu0 %v63_v1  ;;  %238 = vmatprep.subr.mxu1 %v63_v1  ;;  %v61_v3 = vld [vmem:[#allocation6 + $0x8] sm:$0xff]  ;;  %v60_v4 = vld [vmem:[#allocation6] sm:$0xff]  ;;  %vm64_vm1 = vcmask 261120   ;;  %s323_s24 = smov [#allocation8]  }
  0x1e   :  { %50 = vst.msk [vmem:[#allocation2 + $0x10] sm:$0xff] %vm47_vm0, %v322_v0  ;;  %51 = vst.msk [vmem:[#allocation2 + $0x18] sm:$0xff] %vm47_vm0, %v322_v0  ;;  %225 = vmatpush3.msra.mxu0 %v63_v1  ;;  %242 = vmatpush3.msra.mxu1 %v63_v1  ;;  %v56_v5 = vld [vmem:[#allocation3] sm:$0xff]  ;;  %v58_v6 = vld [vmem:[#allocation3 + $0x10] sm:$0xff]  ;;  %s198_s25 = sshll.u32 %s323_s24, 4  ;;  %s199_s25 = int_to_ptr.vmem [resolvable:$true] %s198_s25 }
  0x1f   :  { %226 = vmatprep.subr.mxu0 %v62_v2  ;;  %239 = vmatprep.subr.mxu1 %v62_v2  ;;  %v57_v7 = vld [vmem:[#allocation3 + $0x8] sm:$0xff]  ;;  %v59_v8 = vld [vmem:[#allocation3 + $0x18] sm:$0xff]  ;;  %v215_v21 = vld [vmem:[%s379_s2] ss:$0 sm:$0xff]  ;;  %s292_s2 = scalar_lea.vmem %s199_s25, 512  ;;  %p297_p11 = scmp.lt.s32.totalorder %s199_s25, %s199_s25 }
  0x20   :  { %227 = vmatpush3.msra.mxu0 %v62_v2  ;;  %243 = vmatpush3.msra.mxu1 %v62_v2  ;;  %p293_p10 = scmp.ne.s32.totalorder %s199_s25, %s292_s2  ;;  %p298_p12 = scmp.lt.s32.totalorder %s292_s2, %s292_s2 }
  0x21   :  { %228 = vmatprep.subr.mxu0 %v61_v3  ;;  %240 = vmatprep.subr.mxu1 %v61_v3 }
  0x22   :  { %229 = vmatpush3.msra.mxu0 %v61_v3  ;;  %244 = vmatpush3.msra.mxu1 %v61_v3  ;;  %p299_p13 = por %p298_p12, %p297_p11 }
  0x23   :  { %230 = vmatprep.subr.mxu0 %v60_v4  ;;  %241 = vmatprep.subr.mxu1 %v60_v4 }
  0x24   :  { %231 = vmatpush3.msra.mxu0 %v60_v4  ;;  %245 = vmatpush3.msra.mxu1 %v60_v4  ;;  %v53_v9 = vld [vmem:[#allocation2 + $0x8] sm:$0xff]  ;;  %v52_v13 = vld [vmem:[#allocation2] sm:$0xff]  ;;  %p300_p0 = pnand %p299_p13, %p293_p10 }
  0x25   :  { %232 = vmatprep.mubr.msk.f32.mxu0 %vm64_vm1, %v56_v5  ;;  %235 = vmatprep.mubr.msk.f32.mxu1 %vm64_vm1, %v58_v6  ;;  %v55_v10 = vld [vmem:[#allocation2 + $0x18] sm:$0xff]  ;;  %v54_v14 = vld [vmem:[#allocation2 + $0x10] sm:$0xff] }
  0x26   :  { %233 = vmatmul.mubr.msk.f32.vlgmr.msra.gmra.mxu0 %vm64_vm1, %v57_v7  ;;  %236 = vmatmul.mubr.msk.f32.vlgmr.msra.gmra.mxu1 %vm64_vm1, %v59_v8 }
  0xe6   :  { %v234_v11 = vpop.f32.mrf.mxu0  ;;  %v237_v12 = vpop.f32.mrf.mxu1 }
  0xe7   :  { %v163_v15 = vadd.f32 %v234_v11, %v53_v9  ;;  %v165_v16 = vadd.f32 %v237_v12, %v55_v10 }
  0xe8   :  { %v143_v17 = vpop.f32.mrf.mxu0  ;;  %v153_v18 = vpop.f32.mrf.mxu1 }
  0xe9   :  { %168 = vst.msk [vmem:[#allocation2 + $0x8] sm:$0xff] %vm47_vm0, %v163_v15  ;;  %170 = vst.msk [vmem:[#allocation2 + $0x18] sm:$0xff] %vm47_vm0, %v165_v16  ;;  %v162_v19 = vadd.f32 %v143_v17, %v52_v13  ;;  %v164_v20 = vadd.f32 %v153_v18, %v54_v14 }
  0xeb   :  { %167 = vst.msk [vmem:[#allocation2] sm:$0xff] %vm47_vm0, %v162_v19  ;;  %169 = vst.msk [vmem:[#allocation2 + $0x10] sm:$0xff] %vm47_vm0, %v164_v20 }
  0xf0   :  { %v175_v22 = vld [vmem:[#allocation2 + $0x8] sm:$0xff]  ;;  %v177_v23 = vld [vmem:[#allocation2 + $0x18] sm:$0xff] }
  0xf1   :  { %v186_v24 = vadd.f32 %v215_v21, %v175_v22  ;;  %v188_v25 = vadd.f32 %v215_v21, %v177_v23 }
  0xf2   :  { %v174_v26 = vld [vmem:[#allocation2] sm:$0xff]  ;;  %v176_v27 = vld [vmem:[#allocation2 + $0x10] sm:$0xff] }
  0xf3   :  { %v185_v28 = vadd.f32 %v215_v21, %v174_v26  ;;  %v187_v29 = vadd.f32 %v215_v21, %v176_v27  ;;  %190 = vst.msk [vmem:[#allocation8 + $0x8] sm:$0xff] %vm47_vm0, %v186_v24  ;;  %192 = vst.msk [vmem:[#allocation8 + $0x18] sm:$0xff] %vm47_vm0, %v188_v25 }
  0xf5   :  { %189 = vst.msk [vmem:[#allocation8] sm:$0xff] %vm47_vm0, %v185_v28  ;;  %191 = vst.msk [vmem:[#allocation8 + $0x10] sm:$0xff] %vm47_vm0, %v187_v29 }
  0xf6   :  { %303 = shalt.err (!%p300_p0)
}
  0xf7   :  { %204 = dma.vmem_to_hbm [thread:$0]  %s199_s25, 512, %s380_s3, [#allocation5], %s319_s15, %s319_s15, %s320_s16  }
  0xf8   :  { %316 = dma.done.wait [#allocation5], 512  }
  0xf9   :  { %317 = vsyncadd [#allocation5], 4294966784 }
  0xfa   :  { %208 = vsyncpa [#allocation4], 1 }
  0xfb   :  { %209 = vsyncpa [#allocation7], 1 }
  0xfc   :  { %210 = vsyncpa [#allocation5], 1 }

</bundles_post_ra>
